<compile_context>
chip_gen: v7x
topology: tpu7x:2x2x1
jax: 0.10.0
libtpu: 0.0.40
codegen_flags: <defaults>
</compile_context>

<pallas_src>
from functools import partial

import jax
import jax.numpy as jnp
from jax import lax
from jax.experimental import pallas as pl
from jax.experimental.pallas import tpu as pltpu

D_in = 22
D_out = 3


def _round_up(n, m):
    return ((n + m - 1) // m) * m


def _mlp_kernel(x_ref, w1_ref, b1_ref, w2_ref, b2_ref, w3_ref, b3_ref,
                w4_ref, b4_ref, o_ref):
    # x_ref: [TB, D_in] f32 (natural layout).  wN_ref: [out, in] bf16.  bN_ref: [out, 1] f32.
    x = x_ref[...].astype(jnp.bfloat16)                                   # [TB, 22]

    # Layer 1: contract the shared minor dim (22) of W1 and x -> result is batch-on-lanes.
    #   h1^T = W1 @ x^T, expressed via dot_general so the MXU handles the transposed feed.
    h = lax.dot_general(w1_ref[...], x,
                        dimension_numbers=(((1,), (1,)), ((), ())),
                        preferred_element_type=jnp.float32)               # [16, TB] f32
    h = jnp.maximum(h + b1_ref[...], 0.0)

    h = jnp.dot(w2_ref[...], h.astype(jnp.bfloat16),
                preferred_element_type=jnp.float32)                       # [8, TB]
    h = jnp.maximum(h + b2_ref[...], 0.0)

    h = jnp.dot(w3_ref[...], h.astype(jnp.bfloat16),
                preferred_element_type=jnp.float32)                       # [4, TB]
    h = jnp.maximum(h + b3_ref[...], 0.0)

    h = jnp.dot(w4_ref[...], h.astype(jnp.bfloat16),
                preferred_element_type=jnp.float32)                       # [3, TB]
    o_ref[...] = (h + b4_ref[...]).astype(o_ref.dtype)


@partial(jax.jit, static_argnames=("block_b",))
def jstocks_forward_pallas(x, params, *, block_b=4096):
    """x: [B, D_in] float32. params: PyTorch layout — w{i}: [out, in], b{i}: [out]."""
    B = x.shape[0]

    # Batch tile: multiple of 128 lanes, no larger than the (lane-rounded) batch.
    # block_b=4096 keeps the double-buffered input (~4 MB) well under every chip's
    # default scoped-VMEM limit (v5e 16 MB / v6e 32 MB / v7x 32 MB).
    TB = max(128, min(_round_up(block_b, 128), _round_up(B, 128)))
    num_tiles = pl.cdiv(B, TB)

    w1 = params["w1"].astype(jnp.bfloat16)                                # [16, 22]
    w2 = params["w2"].astype(jnp.bfloat16)                                # [8, 16]
    w3 = params["w3"].astype(jnp.bfloat16)                                # [4, 8]
    w4 = params["w4"].astype(jnp.bfloat16)                                # [3, 4]
    b1 = params["b1"].reshape(-1, 1).astype(jnp.float32)                  # [16, 1]
    b2 = params["b2"].reshape(-1, 1).astype(jnp.float32)                  # [8, 1]
    b3 = params["b3"].reshape(-1, 1).astype(jnp.float32)                  # [4, 1]
    b4 = params["b4"].reshape(-1, 1).astype(jnp.float32)                  # [3, 1]

    # Weights/biases: full-array block, constant index -> DMA'd once, VMEM-resident.
    const_spec = lambda a: pl.BlockSpec(a.shape, lambda i: (0, 0))

    out_t = pl.pallas_call(
        _mlp_kernel,
        out_shape=jax.ShapeDtypeStruct((D_out, B), jnp.float32),
        grid=(num_tiles,),
        in_specs=[
            pl.BlockSpec((TB, D_in), lambda i: (i, 0)),                   # natural-layout x tile
            const_spec(w1), const_spec(b1),
            const_spec(w2), const_spec(b2),
            const_spec(w3), const_spec(b3),
            const_spec(w4), const_spec(b4),
        ],
        out_specs=pl.BlockSpec((D_out, TB), lambda i: (0, i)),            # lane-dense output
        compiler_params=pltpu.CompilerParams(
            dimension_semantics=("parallel",),                            # megacore on v7x
        ),
    )(x, w1, b1, w2, b2, w3, b3, w4, b4)

    # Tiny layout fix-up back to the PyTorch interface ([B, 3]); consumers that can take
    # the [3, B] slab directly (e.g. a fused loss) should skip this transpose.
    return out_t.T                                                        # [B, D_out] f32


def jstocks_forward(x, params, *, block_b=4096, min_pallas_rows=4096):
    """Dispatch: tiny batches stay on plain XLA (kernel launch overhead dominates there)."""
    if x.shape[0] < min_pallas_rows:
        return _reference_forward(x, params)
    return jstocks_forward_pallas(x, params, block_b=block_b)


def init_params(key):
    """Deterministic init mirroring nn.Linear's U(-1/sqrt(fan_in), 1/sqrt(fan_in)).
    Stored in PyTorch-native layout: w is [out_features, in_features], b is [out_features]."""
    dims = [(D_in, 16), (16, 8), (8, 4), (4, D_out)]
    params = {}
    for i, (fan_in, fan_out) in enumerate(dims, start=1):
        key, kw, kb = jax.random.split(key, 3)
        bound = 1.0 / jnp.sqrt(float(fan_in))
        params[f"w{i}"] = jax.random.uniform(
            kw, (fan_out, fan_in), jnp.float32, -bound, bound)
        params[f"b{i}"] = jax.random.uniform(
            kb, (fan_out,), jnp.float32, -bound, bound)
    return params


def _reference_forward(x, params):
    """Pure-f32 reference (PyTorch semantics: y = x @ W.T + b)."""
    h = x
    for i in range(1, 5):
        h = h @ params[f"w{i}"].T + params[f"b{i}"]
        if i < 4:
            h = jnp.maximum(h, 0.0)
    return h


def _reference_forward_bf16(x, params):
    """Reference emulating the kernel's numerics (bf16 MXU inputs, f32 accumulate)."""
    h = x
    for i in range(1, 5):
        w = params[f"w{i}"].astype(jnp.bfloat16)
        h = jnp.dot(h.astype(jnp.bfloat16), w.T,
                    preferred_element_type=jnp.float32) + params[f"b{i}"]
        if i < 4:
            h = jnp.maximum(h, 0.0)
    return h


if __name__ == "__main__":
    key = jax.random.PRNGKey(0)
    key, kx = jax.random.split(key)

    # Small demo batch; 300 is deliberately not a multiple of 128 so both the multi-tile
    # grid (block_b=128 -> 3 tiles, ragged last tile) and the single-partial-tile path
    # (default block_b -> one 384-wide tile) are exercised.
    B = 300
    x = jax.random.normal(kx, (B, D_in), jnp.float32)
    params = init_params(key)

    out = jstocks_forward_pallas(x, params, block_b=128)
    out = jax.block_until_ready(out)
    assert out.shape == (B, D_out)

    out_default = jax.block_until_ready(jstocks_forward_pallas(x, params))
    assert jnp.allclose(out, out_default, atol=1e-5, rtol=1e-5), "tile-size mismatch"

    ref_bf16 = _reference_forward_bf16(x, params)   # matches kernel numerics
    ref_f32 = _reference_forward(x, params)         # PyTorch-f32 semantics

    assert jnp.allclose(out, ref_bf16, atol=5e-3, rtol=5e-3), "mismatch vs bf16 reference"
    assert jnp.allclose(out, ref_f32, atol=1e-1, rtol=1e-1), "mismatch vs f32 reference"

    # Tiny-batch dispatch path (plain XLA) stays exact w.r.t. the f32 reference.
    out_small = jstocks_forward(x[:8], params)
    assert jnp.allclose(out_small, ref_f32[:8], atol=1e-5, rtol=1e-5)

    print("KERNEL_OK")
</pallas_src>

<mosaic_0001>
module attributes {stable_mosaic.version = 11 : i64} {
  func.func @_mlp_kernel(%arg0: i32, %arg1: memref<128x22xf32, #tpu.memory_space<vmem>>, %arg2: memref<16x22xbf16, #tpu.memory_space<vmem>>, %arg3: memref<16x1xf32, #tpu.memory_space<vmem>>, %arg4: memref<8x16xbf16, #tpu.memory_space<vmem>>, %arg5: memref<8x1xf32, #tpu.memory_space<vmem>>, %arg6: memref<4x8xbf16, #tpu.memory_space<vmem>>, %arg7: memref<4x1xf32, #tpu.memory_space<vmem>>, %arg8: memref<3x4xbf16, #tpu.memory_space<vmem>>, %arg9: memref<3x1xf32, #tpu.memory_space<vmem>>, %arg10: memref<3x128xf32, #tpu.memory_space<vmem>>) attributes {dimension_semantics = [#tpu.dimension_semantics<parallel>], iteration_bounds = array<i64: 3>, scalar_prefetch = 0 : i64, scratch_operands = 0 : i64, tpu.core_type = #tpu.core_type<tc>, window_params = [{transform_indices = @transform_0, window_bounds = array<i64: 128, 22>}, {pipeline_mode = #tpu.pipeline_mode<synchronous>, transform_indices = @transform_1, window_bounds = array<i64: 16, 22>}, {pipeline_mode = #tpu.pipeline_mode<synchronous>, transform_indices = @transform_2, window_bounds = array<i64: 16, 1>}, {pipeline_mode = #tpu.pipeline_mode<synchronous>, transform_indices = @transform_3, window_bounds = array<i64: 8, 16>}, {pipeline_mode = #tpu.pipeline_mode<synchronous>, transform_indices = @transform_4, window_bounds = array<i64: 8, 1>}, {pipeline_mode = #tpu.pipeline_mode<synchronous>, transform_indices = @transform_5, window_bounds = array<i64: 4, 8>}, {pipeline_mode = #tpu.pipeline_mode<synchronous>, transform_indices = @transform_6, window_bounds = array<i64: 4, 1>}, {pipeline_mode = #tpu.pipeline_mode<synchronous>, transform_indices = @transform_7, window_bounds = array<i64: 3, 4>}, {pipeline_mode = #tpu.pipeline_mode<synchronous>, transform_indices = @transform_8, window_bounds = array<i64: 3, 1>}, {transform_indices = @transform_9, window_bounds = array<i64: 3, 128>}]} {
    %c0 = arith.constant 0 : index
    %c0_0 = arith.constant 0 : index
    %0 = vector.load %arg1[%c0, %c0_0] : memref<128x22xf32, #tpu.memory_space<vmem>>, vector<128x22xf32>
    %1 = arith.truncf %0 : vector<128x22xf32> to vector<128x22xbf16>
    %c0_1 = arith.constant 0 : index
    %c0_2 = arith.constant 0 : index
    %2 = vector.load %arg2[%c0_1, %c0_2] : memref<16x22xbf16, #tpu.memory_space<vmem>>, vector<16x22xbf16>
    %cst = arith.constant dense<0.000000e+00> : vector<16x128xf32>
    %3 = tpu.matmul %2, %1, %cst {dimension_numbers = #tpu.dot_dimension_numbers<[1], [1], [0], [0], [0, 0, 1, 0], [], []>} : vector<16x22xbf16>, vector<128x22xbf16>, vector<16x128xf32> -> vector<16x128xf32>
    %c0_3 = arith.constant 0 : index
    %c0_4 = arith.constant 0 : index
    %4 = vector.load %arg3[%c0_3, %c0_4] : memref<16x1xf32, #tpu.memory_space<vmem>>, vector<16x1xf32>
    %5 = vector.broadcast %4 : vector<16x1xf32> to vector<16x128xf32>
    %6 = arith.addf %3, %5 : vector<16x128xf32>
    %cst_5 = arith.constant 0.000000e+00 : f32
    %7 = vector.broadcast %cst_5 : f32 to vector<16x128xf32>
    %8 = arith.maximumf %6, %7 : vector<16x128xf32>
    %c0_6 = arith.constant 0 : index
    %c0_7 = arith.constant 0 : index
    %9 = vector.load %arg4[%c0_6, %c0_7] : memref<8x16xbf16, #tpu.memory_space<vmem>>, vector<8x16xbf16>
    %10 = arith.truncf %8 : vector<16x128xf32> to vector<16x128xbf16>
    %cst_8 = arith.constant dense<0.000000e+00> : vector<8x128xf32>
    %11 = tpu.matmul %9, %10, %cst_8 {dimension_numbers = #tpu.dot_dimension_numbers<[1], [0], [0], [1], [0, 0, 1, 1], [], []>} : vector<8x16xbf16>, vector<16x128xbf16>, vector<8x128xf32> -> vector<8x128xf32>
    %c0_9 = arith.constant 0 : index
    %c0_10 = arith.constant 0 : index
    %12 = vector.load %arg5[%c0_9, %c0_10] : memref<8x1xf32, #tpu.memory_space<vmem>>, vector<8x1xf32>
    %13 = vector.broadcast %12 : vector<8x1xf32> to vector<8x128xf32>
    %14 = arith.addf %11, %13 : vector<8x128xf32>
    %cst_11 = arith.constant 0.000000e+00 : f32
    %15 = vector.broadcast %cst_11 : f32 to vector<8x128xf32>
    %16 = arith.maximumf %14, %15 : vector<8x128xf32>
    %c0_12 = arith.constant 0 : index
    %c0_13 = arith.constant 0 : index
    %17 = vector.load %arg6[%c0_12, %c0_13] : memref<4x8xbf16, #tpu.memory_space<vmem>>, vector<4x8xbf16>
    %18 = arith.truncf %16 : vector<8x128xf32> to vector<8x128xbf16>
    %cst_14 = arith.constant dense<0.000000e+00> : vector<4x128xf32>
    %19 = tpu.matmul %17, %18, %cst_14 {dimension_numbers = #tpu.dot_dimension_numbers<[1], [0], [0], [1], [0, 0, 1, 1], [], []>} : vector<4x8xbf16>, vector<8x128xbf16>, vector<4x128xf32> -> vector<4x128xf32>
    %c0_15 = arith.constant 0 : index
    %c0_16 = arith.constant 0 : index
    %20 = vector.load %arg7[%c0_15, %c0_16] : memref<4x1xf32, #tpu.memory_space<vmem>>, vector<4x1xf32>
    %21 = vector.broadcast %20 : vector<4x1xf32> to vector<4x128xf32>
    %22 = arith.addf %19, %21 : vector<4x128xf32>
    %cst_17 = arith.constant 0.000000e+00 : f32
    %23 = vector.broadcast %cst_17 : f32 to vector<4x128xf32>
    %24 = arith.maximumf %22, %23 : vector<4x128xf32>
    %c0_18 = arith.constant 0 : index
    %c0_19 = arith.constant 0 : index
    %25 = vector.load %arg8[%c0_18, %c0_19] : memref<3x4xbf16, #tpu.memory_space<vmem>>, vector<3x4xbf16>
    %26 = arith.truncf %24 : vector<4x128xf32> to vector<4x128xbf16>
    %cst_20 = arith.constant dense<0.000000e+00> : vector<3x128xf32>
    %27 = tpu.matmul %25, %26, %cst_20 {dimension_numbers = #tpu.dot_dimension_numbers<[1], [0], [0], [1], [0, 0, 1, 1], [], []>} : vector<3x4xbf16>, vector<4x128xbf16>, vector<3x128xf32> -> vector<3x128xf32>
    %c0_21 = arith.constant 0 : index
    %c0_22 = arith.constant 0 : index
    %28 = vector.load %arg9[%c0_21, %c0_22] : memref<3x1xf32, #tpu.memory_space<vmem>>, vector<3x1xf32>
    %29 = vector.broadcast %28 : vector<3x1xf32> to vector<3x128xf32>
    %30 = arith.addf %27, %29 : vector<3x128xf32>
    %c0_23 = arith.constant 0 : index
    %c0_24 = arith.constant 0 : index
    %31 = vector.load %arg10[%c0_23, %c0_24] : memref<3x128xf32, #tpu.memory_space<vmem>>, vector<3x128xf32>
    tpu.vector_store %arg10[%c0_23, %c0_24], %30 {strides = array<i32>} : memref<3x128xf32, #tpu.memory_space<vmem>>, vector<3x128xf32>,
    return
  }
  func.func @transform_0(%arg0: i32) -> (i32, i32) {
    %c0_i32 = arith.constant 0 : i32
    %c0_i32_0 = arith.constant 0 : i32
    return %arg0, %c0_i32 : i32, i32
  }
  func.func @transform_1(%arg0: i32) -> (i32, i32) {
    %c0_i32 = arith.constant 0 : i32
    %c0_i32_0 = arith.constant 0 : i32
    %c0_i32_1 = arith.constant 0 : i32
    return %c0_i32, %c0_i32_0 : i32, i32
  }
  func.func @transform_2(%arg0: i32) -> (i32, i32) {
    %c0_i32 = arith.constant 0 : i32
    %c0_i32_0 = arith.constant 0 : i32
    %c0_i32_1 = arith.constant 0 : i32
    return %c0_i32, %c0_i32_0 : i32, i32
  }
  func.func @transform_3(%arg0: i32) -> (i32, i32) {
    %c0_i32 = arith.constant 0 : i32
    %c0_i32_0 = arith.constant 0 : i32
    %c0_i32_1 = arith.constant 0 : i32
    return %c0_i32, %c0_i32_0 : i32, i32
  }
  func.func @transform_4(%arg0: i32) -> (i32, i32) {
    %c0_i32 = arith.constant 0 : i32
    %c0_i32_0 = arith.constant 0 : i32
    %c0_i32_1 = arith.constant 0 : i32
    return %c0_i32, %c0_i32_0 : i32, i32
  }
  func.func @transform_5(%arg0: i32) -> (i32, i32) {
    %c0_i32 = arith.constant 0 : i32
    %c0_i32_0 = arith.constant 0 : i32
    %c0_i32_1 = arith.constant 0 : i32
    return %c0_i32, %c0_i32_0 : i32, i32
  }
  func.func @transform_6(%arg0: i32) -> (i32, i32) {
    %c0_i32 = arith.constant 0 : i32
    %c0_i32_0 = arith.constant 0 : i32
    %c0_i32_1 = arith.constant 0 : i32
    return %c0_i32, %c0_i32_0 : i32, i32
  }
  func.func @transform_7(%arg0: i32) -> (i32, i32) {
    %c0_i32 = arith.constant 0 : i32
    %c0_i32_0 = arith.constant 0 : i32
    %c0_i32_1 = arith.constant 0 : i32
    return %c0_i32, %c0_i32_0 : i32, i32
  }
  func.func @transform_8(%arg0: i32) -> (i32, i32) {
    %c0_i32 = arith.constant 0 : i32
    %c0_i32_0 = arith.constant 0 : i32
    %c0_i32_1 = arith.constant 0 : i32
    return %c0_i32, %c0_i32_0 : i32, i32
  }
  func.func @transform_9(%arg0: i32) -> (i32, i32) {
    %c0_i32 = arith.constant 0 : i32
    %c0_i32_0 = arith.constant 0 : i32
    return %c0_i32, %arg0 : i32, i32
  }
}

</mosaic_0001>

<bundles_post_ra>
// kernel: jstocks_forward_pallas.1
= control target key start
LH: loop header
LB: loop body
LE: loop exit
PB: predicated region body
PF: predicated region fallthrough
CT: control target
= control target key end

     0   :  { %14 = vsyncpa [#allocation3], 0  ;;  %s1112_s0 = inlined_call_operand.vmem [shape: f32[300,22], index: 0, kind: input, shape index: {}]   ;;  %s1113_s1 = inlined_call_operand.vmem [shape: bf16[16,22], index: 1, kind: input, shape index: {}]   ;;  %s1114_s2 = inlined_call_operand.vmem [shape: f32[16,1], index: 2, kind: input, shape index: {}]   ;;  %s1115_s3 = inlined_call_operand.vmem [shape: bf16[8,16], index: 3, kind: input, shape index: {}]   ;;  %s1116_s4 = inlined_call_operand.vmem [shape: f32[8,1], index: 4, kind: input, shape index: {}]   ;;  %s1117_s5 = inlined_call_operand.vmem [shape: bf16[4,8], index: 5, kind: input, shape index: {}]   ;;  %s1118_s6 = inlined_call_operand.vmem [shape: f32[4,1], index: 6, kind: input, shape index: {}]   ;;  %s1119_s7 = inlined_call_operand.vmem [shape: bf16[3,4], index: 7, kind: input, shape index: {}]   ;;  %s1120_s8 = inlined_call_operand.vmem [shape: f32[3,1], index: 8, kind: input, shape index: {}]   ;;  %s1121_s9 = inlined_call_operand.hbm [shape: f32[3,300], index: 9, kind: output, shape index: {}]  }
   0x1   :  { %16 = vsyncpa [#allocation3 + $0x1], 0  ;;  %s940_s30 = smov 0   ;;  %s942_s10 = smov 0  }
   0x2   :  { %s944_s11 = smov 0   ;;  %s946_s12 = smov 0  }
   0x3 LB: > { %s961_s13 = sadd.s32 4294967295, %s884_s12   ;;  %s708_s14 = sadd.s32 4294967294, %s884_s12   ;;  %s884_s12 = sphi %s946_s12, %s1127_s12   ;;  %s880_s11 = sphi %s944_s11, %s1126_s11   ;;  %s876_s10 = sphi %s942_s10, %s1125_s10   ;;  %s872_s30 = sphi %s940_s30, %s1124_s30  }
   0x4   : > { %s965_s15 = sadd.s32 1, %s884_s12   ;;  %s223_s16 = sadd.s32 1, %s880_s11 }
   0x5   : > { %s220_s17 = ssub.s32 %s884_s12, %s965_s15  ;;  %p233_p0 = scmp.ne.s32.totalorder %s880_s11, %s876_s10 }
   0x6   : > { %p221_p1 = scmp.eq.s32.totalorder %s220_s17, 0  ;;  %p234_p2 = scmp.eq.s32.totalorder %s961_s13, 2 }
   0x7   : > { %p239_p3 = scmp.ne.s32.totalorder %s876_s10, %s872_s30  ;;  %p240_p4 = scmp.eq.s32.totalorder %s708_s14, 2 }
   0x8   : > { %s976_s18 = scalar_select %p221_p1, %s880_s11, %s223_s16  }
   0x9   : > { %p978_p5 = por %p234_p2, %p233_p0  ;;  %p982_p6 = por %p240_p4, %p239_p3 }
   0xa   : > { %p711_p7 = scmp.ge.s32.totalorder %s884_s12, 1  ;;  %p299_p8 = scmp.lt.s32.totalorder %s884_s12, 4 }
   0xc   : > { %p300_p9 = pnand %p711_p7, %p299_p8 }
   0xd   : > { %s713_s21 = sshll.u32 (!%p300_p9), %s961_s13, 4  ;;  %v886_v0 = vmov (!%p300_p9), 0.0   ;;  %vm887_vm0 = vmmov (!%p300_p9), 0   ;;  %v380_v1 = vld [vmem:[%s1114_s2] sm:$0xff] (!%p300_p9)  ;;  %v888_v2 = vmov (!%p300_p9), 0   ;;  %v381_v3 = vld [vmem:[%s1114_s2 + $0x8] sm:$0xff] (!%p300_p9) }
   0xe   : > { %303 = sbr.rel (%p300_p9) target bundleno = 986 (0x3da), region = 56  ;;  %739 = vmatprep.subr.bf16.mxu0 (!%p300_p9), %v886_v0  ;;  %p344_p10 = scmp.lt.s32.totalorder (!%p300_p9), %s713_s21, 37  ;;  %755 = vmatprep.mubr.msk.bf16.mxu0 (!%p300_p9), %vm887_vm0, %v886_v0  ;;  %vm397_vm1 = vcmask (!%p300_p9), 179200   ;;  %v580_v7 = vld [vmem:[%s1120_s8] sm:$0x7] (!%p300_p9)  ;;  %vm476_vm2 = vcmask (!%p300_p9), 130048  }
   0xf   : > { %819 = vset.pattern.permute.xlu0 (!%p300_p9), %v888_v2  ;;  %759 = vmatprep.subr.bf16.mxu1 (!%p300_p9), %v886_v0  ;;  %v821_v37 = vld [vmem:[%s1113_s1] sm:$0xff] (!%p300_p9)   ;;  %vm533_vm3 = vcmask (!%p300_p9), 1043456   ;;  %vm529_vm4 = vcmask (!%p300_p9), 64512   ;;  %vm590_vm5 = vcmask (!%p300_p9), 1041408   ;;  %vm586_vm6 = vcmask (!%p300_p9), 31744   ;;  %s336_s17 = sand.u32 (!%p300_p9), 1, %s876_s10  }
  0x10   : > { %384 = vperm.xlu0 (!%p300_p9), %819, %v380_v1   ;;  %761 = vmatprep.mubr.msk.bf16.mxu1 (!%p300_p9), %vm887_vm0, %v886_v0  ;;  %v470_v38 = vld [vmem:[%s1116_s4] sm:$0xff] (!%p300_p9)  ;;  %s721_s22 = sshll.u32 (!%p300_p9), %s961_s13, 6  ;;  %s636_s13 = scalar_lea.sflag (!%p300_p9), [#allocation3], %s336_s17 }
  0x11   : > { %820 = vset.pattern.permute.xlu1 (!%p300_p9), %v888_v2  ;;  %v523_v39 = vld [vmem:[%s1118_s6] sm:$0xf] (!%p300_p9)  ;;  %s1070_s27 = scalar_lea.hbm (!%p300_p9), %s1121_s9, %s721_s22 }
  0x12   : > { %473 = vperm.xlu1 (!%p300_p9), %820, %v470_v38   ;;  %v468_v51 = vld [vmem:[%s1115_s3] sm:$0xf] (!%p300_p9) }
  0x13   : > { %v521_v61 = vld [vmem:[%s1117_s5] sm:$0x3] (!%p300_p9) }
  0x14   : > { %389 = vperm.xlu0 (!%p300_p9), %819, %v381_v3  }
  0x15   : > { %s1129_s21 = smov (!%p344_p10, %s713_s21), 37 }
  0x16   : > { %s714_s26 = sshll.u32 %s1129_s21, 3  ;;  %526 = vperm.xlu1 %820, %v523_v39   ;;  %s712_s21 = sshll.u32 %s336_s17, 2 }
  0x17   : > { %s1004_s29 = scalar_lea.vmem %s1112_s0, %s714_s26  ;;  %s338_s23 = scalar_lea.vmem [#allocation2], %s712_s21 }
  0x18   : > { %v354_v4 = vld [vmem:[%s1004_s29] sm:$0xff]  ;;  %v355_v5 = vld [vmem:[%s1004_s29 + $0x8] sm:$0xff]  ;;  %v356_v8 = vld [vmem:[%s1004_s29 + $0x10] sm:$0xff]  ;;  %583 = vperm.xlu0 %819, %v580_v7   ;;  %s649_s24 = sshll.u32 %s338_s23, 4  ;;  %s1072_s24 = int_to_ptr.vmem [resolvable:$true] %s649_s24 }
  0x19   : > { %v370_v6 = vpack.c.bf16 %v355_v5, %v354_v4  ;;  %v357_v9 = vld [vmem:[%s1004_s29 + $0x18] sm:$0xff]  ;;  %v358_v13 = vld [vmem:[%s1004_s29 + $0x20] sm:$0xff]  ;;  %v359_v14 = vld [vmem:[%s1004_s29 + $0x28] sm:$0xff]  ;;  %s822_s28 = scalar_lea.vmem %s1072_s24, 64 }
  0x1a   : > { %v371_v11 = vpack.c.bf16 %v357_v9, %v356_v8  ;;  %v372_v15 = vpack.c.bf16 %v359_v14, %v358_v13  ;;  %v360_v17 = vld [vmem:[%s1004_s29 + $0x30] sm:$0xff]  ;;  %v361_v18 = vld [vmem:[%s1004_s29 + $0x38] sm:$0xff]  ;;  %v362_v21 = vld [vmem:[%s1004_s29 + $0x40] sm:$0xff]  ;;  %p823_p11 = scmp.ne.s32.totalorder %s1072_s24, %s822_s28 }
  0x1b   : > { %v402_v10 = vsel %vm397_vm1, %v370_v6, 0  ;;  %v373_v19 = vpack.c.bf16 %v361_v18, %v360_v17  ;;  %v363_v22 = vld [vmem:[%s1004_s29 + $0x48] sm:$0xff]  ;;  %v364_v25 = vld [vmem:[%s1004_s29 + $0x50] sm:$0xff]  ;;  %v365_v26 = vld [vmem:[%s1004_s29 + $0x58] sm:$0xff] }
  0x1c   : > { %740 = vmatpush3.bf16.xpose.msra.mxu0 %v402_v10  ;;  %v405_v12 = vsel %vm397_vm1, %v371_v11, 0  ;;  %v408_v16 = vsel %vm397_vm1, %v372_v15, 0  ;;  %v374_v23 = vpack.c.bf16 %v363_v22, %v362_v21  ;;  %v375_v27 = vpack.c.bf16 %v365_v26, %v364_v25  ;;  %v366_v29 = vld [vmem:[%s1004_s29 + $0x60] sm:$0xff]  ;;  %v367_v30 = vld [vmem:[%s1004_s29 + $0x68] sm:$0xff]  ;;  %v368_v33 = vld [vmem:[%s1004_s29 + $0x70] sm:$0xff]  ;;  %p824_p12 = pnand %p823_p11, %p978_p5 }
  0x1d   : > { %741 = vmatprep.subr.bf16.mxu0 %v886_v0  ;;  %v411_v20 = vsel %vm397_vm1, %v373_v19, 0  ;;  %v376_v31 = vpack.c.bf16 %v367_v30, %v366_v29  ;;  %v369_v34 = vld [vmem:[%s1004_s29 + $0x78] sm:$0xff]  ;;  %v578_v8 = vld [vmem:[%s1119_s7] sm:$0x3]  ;;  %s889_s29 = smov [#allocation2]  }
  0x1e   : > { %v414_v24 = vsel %vm397_vm1, %v374_v23, 0  ;;  %v417_v28 = vsel %vm397_vm1, %v375_v27, 0  ;;  %v377_v35 = vpack.c.bf16 %v369_v34, %v368_v33  ;;  %p825_p13 = pneg %p824_p12  ;;  %s826_s14 = sshll.u32 %s889_s29, 4  ;;  %s827_s14 = int_to_ptr.vmem [resolvable:$false] %s826_s14 }
  0x1f   : > { %v420_v32 = vsel %vm397_vm1, %v376_v31, 0  ;;  %s828_s16 = scalar_lea.vmem %s827_s14, 128  ;;  %p829_p0 = scmp.lt.s32.totalorder %s1072_s24, %s827_s14 }
  0x20   : > { %v423_v36 = vsel %vm397_vm1, %v377_v35, 0  ;;  %p830_p1 = scmp.lt.s32.totalorder %s828_s16, %s822_s28 }
  0x22   : > { %p831_p2 = por %p830_p1, %p829_p0 }
  0x24   : > { %742 = vmatpush3.bf16.xpose.msra.mxu0 %v405_v12  ;;  %p832_p3 = pnand %p831_p2, %p825_p13 }
  0x25   : > { %743 = vmatprep.subr.bf16.mxu0 %v886_v0 }
  0x2c   : > { %744 = vmatpush3.bf16.xpose.msra.mxu0 %v408_v16 }
  0x2d   : > { %745 = vmatprep.subr.bf16.mxu0 %v886_v0 }
  0x34   : > { %746 = vmatpush3.bf16.xpose.msra.mxu0 %v411_v20 }
  0x35   : > { %747 = vmatprep.subr.bf16.mxu0 %v886_v0 }
  0x3c   : > { %748 = vmatpush3.bf16.xpose.msra.mxu0 %v414_v24 }
  0x3d   : > { %749 = vmatprep.subr.bf16.mxu0 %v886_v0 }
  0x44   : > { %750 = vmatpush3.bf16.xpose.msra.mxu0 %v417_v28 }
  0x45   : > { %751 = vmatprep.subr.bf16.mxu0 %v886_v0 }
  0x4c   : > { %752 = vmatpush3.bf16.xpose.msra.mxu0 %v420_v32 }
  0x4d   : > { %753 = vmatprep.subr.bf16.mxu0 %v886_v0 }
  0x54   : > { %754 = vmatpush3.bf16.xpose.msra.mxu0 %v423_v36 }
  0x5b   : > { %756 = vmatmul.mubr.msk.bf16.vlgmr.msra.gmra.mrb[0].mxu0 %vm397_vm1, %v821_v37 }
  0x8f   : > { %v385_v40 = vpop.permute.xlu0 %384 }
  0x91   : > { %v474_v52 = vpop.permute.xlu1 %473 }
  0x93   : > { %v390_v44 = vpop.permute.xlu0 %389 }
  0x95   : > { %v527_v62 = vpop.permute.xlu1 %526 }
 0x12e   : > { %v459_v41 = vpop.f32.mrb[0].mxu0 }
 0x12f   : > { %v460_v42 = vadd.f32 %v459_v41, %v385_v40  ;;  %v757_v43 = vpop.f32.mrb[1].mxu0 }
 0x130   : > { %v462_v45 = vpop.f32.mrb[2].mxu0 }
 0x131   : > { %v463_v46 = vadd.f32 %v462_v45, %v390_v44  ;;  %v758_v47 = vpop.f32.mrb[3].mxu0  ;;  %v466_v48 = vmax.f32 %v460_v42, 0.0 }
 0x133   : > { %v467_v49 = vmax.f32 %v463_v46, 0.0 }
 0x135   : > { %v469_v50 = vpack.c.bf16 %v467_v49, %v466_v48 }
 0x137   : > { %760 = vmatpush3.bf16.msra.mxu1 %v469_v50 }
 0x138   : > { %765 = vmatprep.subr.bf16.mxu1 %v886_v0 }
 0x13a   : > { %762 = vmatmul.mubr.msk.bf16.vlgmr.msra.gmra.mrb[0].mxu1 %vm476_vm2, %v468_v51 }
 0x13b   : > { %767 = vmatprep.mubr.msk.bf16.mxu1 %vm887_vm0, %v886_v0 }
 0x20d   : > { %v514_v53 = vpop.f32.mrb[0].mxu1 }
 0x20e   : > { %v515_v54 = vadd.f32 %v514_v53, %v474_v52  ;;  %v763_v55 = vpop.f32.mrb[1].mxu1 }
 0x20f   : > { %v517_v56 = vpop.f32.mrb[2].mxu1 }
 0x210   : > { %v520_v57 = vmax.f32 %v515_v54, 0.0  ;;  %v764_v58 = vpop.f32.mrb[3].mxu1 }
 0x212   : > { %v522_v59 = vpack.c.bf16 %v520_v57, %v520_v57 }
 0x214   : > { %v535_v60 = vsel %vm533_vm3, %v522_v59, 0 }
 0x215   : > { %766 = vmatpush3.bf16.msra.mxu1 %v535_v60 }
 0x216   : > { %771 = vmatprep.subr.bf16.mxu1 %v886_v0 }
 0x218   : > { %768 = vmatmul.mubr.msk.bf16.vlgmr.msra.gmra.mrb[4].mxu1 %vm529_vm4, %v521_v61 }
 0x219   : > { %773 = vmatprep.mubr.msk.bf16.mxu1 %vm887_vm0, %v886_v0  ;;  %v584_v0 = vpop.permute.xlu0 %583 }
 0x2eb   : > { %v571_v63 = vpop.f32.mrb[4].mxu1 }
 0x2ec   : > { %v572_v1 = vadd.f32 %v571_v63, %v527_v62  ;;  %v769_v2 = vpop.f32.mrb[5].mxu1 }
 0x2ed   : > { %v574_v3 = vpop.f32.mrb[6].mxu1 }
 0x2ee   : > { %v577_v4 = vmax.f32 %v572_v1, 0.0  ;;  %v770_v5 = vpop.f32.mrb[7].mxu1 }
 0x2f0   : > { %v579_v6 = vpack.c.bf16 %v577_v4, %v577_v4 }
 0x2f2   : > { %v592_v7 = vsel %vm590_vm5, %v579_v6, 0 }
 0x2f3   : > { %772 = vmatpush3.bf16.msra.mxu1 %v592_v7 }
 0x2f6   : > { %774 = vmatmul.mubr.msk.bf16.vlgmr.msra.gmra.mrb[8].mxu1 %vm586_vm6, %v578_v8 }
 0x3c9   : > { %v628_v9 = vpop.f32.mrb[8].mxu1 }
 0x3ca   : > { %v629_v10 = vadd.f32 %v628_v9, %v584_v0  ;;  %v775_v11 = vpop.f32.mrb[9].mxu1 }
 0x3cb   : > { %v631_v12 = vpop.f32.mrb[10].mxu1 }
 0x3cc   : > { %634 = vst [vmem:[%s338_s23] sm:$0x7] %v629_v10  ;;  %v776_v13 = vpop.f32.mrb[11].mxu1 }
 0x3cd   : > { %835 = shalt.err (!%p832_p3)
}
 0x3ce   : > { %s836_s17 = scalar_lea.hbm %s1070_s27, 64  ;;  %s840_s23 = scalar_lea.hbm %s1121_s9, 192 }
 0x3cf   : > { %p837_p4 = scmp.ne.s32.totalorder %s1070_s27, %s836_s17  ;;  %p841_p9 = scmp.lt.u32.totalorder %s1070_s27, %s1121_s9 }
 0x3d0   : > { %p842_p10 = scmp.lt.u32.totalorder %s840_s23, %s836_s17  ;;  %p844_p12 = scmp.lt.u32.totalorder %s836_s17, %s1070_s27 }
 0x3d1   : > { %p838_p7 = pnand %p837_p4, %p978_p5 }
 0x3d2   : > { %p843_p11 = por %p842_p10, %p841_p9 }
 0x3d3   : > { %p839_p8 = pneg %p838_p7 }
 0x3d4   : > { %p845_p13 = por %p844_p12, %p843_p11 }
 0x3d6   : > { %p846_p0 = pnand %p845_p13, %p839_p8 }
 0x3d8   : > { %849 = shalt.err (!%p846_p0)
}
 0x3d9   : > { %777 = dma.vmem_to_hbm [thread:$0]  (%p978_p5), %s1072_s24, 64, %s1070_s27, %s636_s13  }
 0x3da PF: > { %p783_p1 = scmp.ge.s32.totalorder %s884_s12, 2  ;;  %s661_s28 = sand.u32 1, %s872_s30  }
 0x3db   : > { %s662_s29 = scalar_lea.sflag [#allocation3], %s661_s28 }
 0x3dc   : > { %p780_p2 = pnand %p783_p1, %p982_p6 }
 0x3de   : > { %867 = dma.done.wait (!%p780_p2), %s662_s29, 64  }
 0x3df   : > { %869 = vsyncadd (!%p780_p2), %s662_s29, 4294967232  ;;  %p19_p3 = scmp.ge.s32.totalorder %s965_s15, 5   ;;  %s1124_s30 = smov %s876_s10 }
 0x3e0   : > { %s1125_s10 = smov %s880_s11  ;;  %s1126_s11 = smov %s976_s18 }
 0x3e1   : > { %s1127_s12 = smov %s965_s15  ;;  %21 = sbr.rel (!%p19_p3) target bundleno = 3 (0x3), region = 91 }
 0x3e8   :  { %667 = vsyncpa [#allocation3], 1 }
 0x3e9   :  { %669 = vsyncpa [#allocation3 + $0x1], 1 }

</bundles_post_ra>
